<compile_context>
chip_gen: v7x
topology: tpu7x:2x2x1
jax: 0.10.0
libtpu: 0.0.40
codegen_flags: <defaults>
</compile_context>

<pallas_src>
import functools

import jax
import jax.numpy as jnp
from jax.experimental import pallas as pl
from jax.experimental.pallas import tpu as pltpu


def _l2mae_partial_kernel(x_ref, t_ref, o_ref, *, tm, n_rows):
    """One grid step: per-row L2 norms of a (tm, D) tile -> one partial sum."""
    i = pl.program_id(0)

    diff = x_ref[...].astype(jnp.float32) - t_ref[...].astype(jnp.float32)
    sq = jnp.sum(diff * diff, axis=-1, keepdims=True)            # (tm, 1)

    # Mask rows of the (possibly partial) tail tile: garbage rows -> 0.
    row = jax.lax.broadcasted_iota(jnp.int32, (tm, 1), 0) + i * tm
    dists = jnp.where(row < n_rows, jnp.sqrt(sq), 0.0)           # (tm, 1)

    partial = jnp.sum(dists)                                     # scalar, f32
    o_ref[...] = jnp.broadcast_to(partial, o_ref.shape)


def _choose_row_tile(d, itemsize):
    """Row tile targeting ~1 MiB of real payload per input per grid step while
    keeping 2 inputs x 2 pipeline buffers of the lane-padded block under
    ~16 MiB (comfortably inside the explicit 40 MiB VMEM limit on v5e/v6e and
    v7x's 64 MiB physical VMEM)."""
    lane_pad = pl.cdiv(d, 128) * 128                 # lanes occupied per row in VMEM
    target_rows = (1 << 20) // max(1, d * itemsize)  # ~1 MiB real payload / step
    cap_rows = (16 << 20) // (2 * 2 * lane_pad * itemsize)
    return max(8, min(target_rows, cap_rows))


def l2mae_loss(inp, target, reduction="mean", row_tile=None):
    """Pallas implementation of L2MAELoss.forward.

    inp, target: identically shaped arrays [..., D]; L2 norm over the last
    dim, mean/sum over everything else.  Returns a float32 scalar.
    """
    assert reduction in ("mean", "sum")
    assert inp.shape == target.shape

    d = inp.shape[-1]
    n_rows = 1
    for s in inp.shape[:-1]:
        n_rows *= s
    n_rows = max(n_rows, 1)

    x2 = inp.reshape(n_rows, d)
    t2 = target.reshape(n_rows, d)
    itemsize = jnp.dtype(inp.dtype).itemsize

    tm = row_tile if row_tile is not None else _choose_row_tile(d, itemsize)
    if n_rows <= tm:
        tm = n_rows                      # single full-extent block (always legal)
    else:
        tm = max(8, (tm // 8) * 8)       # sublane-aligned row tile
    num_tiles = pl.cdiv(n_rows, tm)

    kernel = functools.partial(_l2mae_partial_kernel, tm=tm, n_rows=n_rows)

    partials = pl.pallas_call(
        kernel,
        out_shape=jax.ShapeDtypeStruct((num_tiles, 1, 128), jnp.float32),
        grid_spec=pltpu.PrefetchScalarGridSpec(
            num_scalar_prefetch=0,
            grid=(num_tiles,),
            in_specs=[
                pl.BlockSpec((tm, d), lambda i: (i, 0)),   # input row tile
                pl.BlockSpec((tm, d), lambda i: (i, 0)),   # target row tile
            ],
            # One lane-padded block per tile -> disjoint writes, parallel axis.
            out_specs=pl.BlockSpec((1, 1, 128), lambda i: (i, 0, 0)),
        ),
        compiler_params=pltpu.CompilerParams(
            dimension_semantics=("parallel",),        # megacore-shardable (v7x)
            vmem_limit_bytes=40 * 1024 * 1024,        # explicit; safe on v5e/v6e/v7x
        ),
        cost_estimate=pl.CostEstimate(
            flops=3 * n_rows * d,                     # sub + mul + add per element
            transcendentals=n_rows,                   # one sqrt per row
            bytes_accessed=2 * n_rows * d * itemsize + num_tiles * 128 * 4,
        ),
    )(x2, t2)

    total = jnp.sum(partials[:, 0, 0])
    if reduction == "mean":
        total = total / jnp.float32(n_rows)
    return total


def _reference(inp, target, reduction="mean"):
    dists = jnp.linalg.norm(inp - target, axis=-1)
    return jnp.mean(dists) if reduction == "mean" else jnp.sum(dists)


if __name__ == "__main__":
    key = jax.random.PRNGKey(0)
    k1, k2, k3, k4 = jax.random.split(key, 4)

    ok = True

    # Case 1: [batch, seq, hidden] with automatic tile selection (single tile).
    B, S, D = 4, 8, 32
    a = jax.random.normal(k1, (B, S, D), dtype=jnp.float32)
    b = jax.random.normal(k2, (B, S, D), dtype=jnp.float32)
    for reduction in ("mean", "sum"):
        out = jax.block_until_ready(l2mae_loss(a, b, reduction=reduction))
        ref = _reference(a, b, reduction=reduction)
        if not jnp.allclose(out, ref, rtol=1e-5, atol=1e-5):
            ok = False
            print(f"MISMATCH case1 ({reduction}): pallas={out} ref={ref}")

    # Case 2: ragged row count with a forced small tile -> multiple grid steps,
    # parallel per-tile partial sums, masked tail tile.
    N2, D2 = 20, 32
    c = jax.random.normal(k3, (N2, D2), dtype=jnp.float32)
    t = jax.random.normal(k4, (N2, D2), dtype=jnp.float32)
    for reduction in ("mean", "sum"):
        out = jax.block_until_ready(
            l2mae_loss(c, t, reduction=reduction, row_tile=8)
        )
        ref = _reference(c, t, reduction=reduction)
        if not jnp.allclose(out, ref, rtol=1e-5, atol=1e-5):
            ok = False
            print(f"MISMATCH case2 ({reduction}): pallas={out} ref={ref}")

    if ok:
        print("KERNEL_OK")
</pallas_src>

<mosaic_0001>
module attributes {stable_mosaic.version = 11 : i64} {
  func.func @_l2mae_partial_kernel(%arg0: i32, %arg1: memref<32x32xf32, #tpu.memory_space<vmem>>, %arg2: memref<32x32xf32, #tpu.memory_space<vmem>>, %arg3: memref<1x1x128xf32, #tpu.memory_space<vmem>>) attributes {dimension_semantics = [#tpu.dimension_semantics<parallel>], iteration_bounds = array<i64: 1>, scalar_prefetch = 0 : i64, scratch_operands = 0 : i64, tpu.core_type = #tpu.core_type<tc>, window_params = [{transform_indices = @transform_0, window_bounds = array<i64: 32, 32>}, {transform_indices = @transform_1, window_bounds = array<i64: 32, 32>}, {transform_indices = @transform_2, window_bounds = array<i64: 1, 1, 128>}]} {
    %c0 = arith.constant 0 : index
    %c0_0 = arith.constant 0 : index
    %0 = vector.load %arg1[%c0, %c0_0] : memref<32x32xf32, #tpu.memory_space<vmem>>, vector<32x32xf32>
    %c0_1 = arith.constant 0 : index
    %c0_2 = arith.constant 0 : index
    %1 = vector.load %arg2[%c0_1, %c0_2] : memref<32x32xf32, #tpu.memory_space<vmem>>, vector<32x32xf32>
    %2 = arith.subf %0, %1 : vector<32x32xf32>
    %3 = arith.mulf %2, %2 : vector<32x32xf32>
    %cst = arith.constant dense<0.000000e+00> : vector<32xf32>
    %4 = vector.multi_reduction <add>, %3, %cst [1] : vector<32x32xf32> to vector<32xf32>
    %5 = vector.shape_cast %4 : vector<32xf32> to vector<32x1xf32>
    %6 = tpu.iota {dimensions = array<i32: 0>} : vector<32x1xi32>
    %c32_i32 = arith.constant 32 : i32
    %7 = arith.muli %arg0, %c32_i32 : i32
    %8 = vector.broadcast %7 : i32 to vector<32x1xi32>
    %9 = arith.addi %6, %8 : vector<32x1xi32>
    %c32_i32_3 = arith.constant 32 : i32
    %10 = vector.broadcast %c32_i32_3 : i32 to vector<32x1xi32>
    %11 = arith.cmpi slt, %9, %10 : vector<32x1xi32>
    %12 = math.sqrt %5 : vector<32x1xf32>
    %cst_4 = arith.constant 0.000000e+00 : f32
    %13 = vector.broadcast %cst_4 : f32 to vector<32x1xf32>
    %14 = arith.select %11, %12, %13 : vector<32x1xi1>, vector<32x1xf32>
    %15 = vector.shape_cast %14 : vector<32x1xf32> to vector<1x32x1xf32>
    %cst_5 = arith.constant dense<0.000000e+00> : vector<1xf32>
    %16 = vector.multi_reduction <add>, %15, %cst_5 [1, 2] : vector<1x32x1xf32> to vector<1xf32>
    %17 = vector.shape_cast %16 : vector<1xf32> to vector<1x1x1xf32>
    %18 = vector.extract %17[0, 0, 0] : f32 from vector<1x1x1xf32>
    %19 = vector.broadcast %18 : f32 to vector<1x1x128xf32>
    %c0_6 = arith.constant 0 : index
    %c0_7 = arith.constant 0 : index
    %c0_8 = arith.constant 0 : index
    %20 = vector.load %arg3[%c0_6, %c0_7, %c0_8] : memref<1x1x128xf32, #tpu.memory_space<vmem>>, vector<1x1x128xf32>
    tpu.vector_store %arg3[%c0_6, %c0_7, %c0_8], %19 {strides = array<i32>} : memref<1x1x128xf32, #tpu.memory_space<vmem>>, vector<1x1x128xf32>,
    return
  }
  func.func @transform_0(%arg0: i32) -> (i32, i32) {
    %c0_i32 = arith.constant 0 : i32
    %c0_i32_0 = arith.constant 0 : i32
    return %arg0, %c0_i32 : i32, i32
  }
  func.func @transform_1(%arg0: i32) -> (i32, i32) {
    %c0_i32 = arith.constant 0 : i32
    %c0_i32_0 = arith.constant 0 : i32
    return %arg0, %c0_i32 : i32, i32
  }
  func.func @transform_2(%arg0: i32) -> (i32, i32, i32) {
    %c0_i32 = arith.constant 0 : i32
    %c0_i32_0 = arith.constant 0 : i32
    %c0_i32_1 = arith.constant 0 : i32
    return %arg0, %c0_i32, %c0_i32_0 : i32, i32, i32
  }
}

</mosaic_0001>

<bundles_post_ra>
// kernel: tpu_custom_call.1
= control target key start
LH: loop header
LB: loop body
LE: loop exit
PB: predicated region body
PF: predicated region fallthrough
CT: control target
= control target key end

     0   :  { %7 = vsyncpa [#allocation3], 0  ;;  %s298_s0 = inlined_call_operand.hbm [shape: f32[32,32], index: 0, kind: input, shape index: {}]   ;;  %s299_s1 = inlined_call_operand.hbm [shape: f32[32,32], index: 1, kind: input, shape index: {}]   ;;  %s300_s2 = inlined_call_operand.hbm [shape: f32[1,1,128], index: 2, kind: output, shape index: {}]  }
   0x1   :  { %8 = vsyncpa [#allocation6], 0 }
   0x2   :  { %9 = vsyncpa [#allocation4], 0  ;;  %s238_s9 = smov [#allocation2]   ;;  %s166_s13 = scalar_lea.hbm %s298_s0, 512 }
   0x3   :  { %s15_s10 = sshll.u32 %s238_s9, 4  ;;  %p167_p0 = scmp.ne.s32.totalorder %s298_s0, %s166_s13  ;;  %s16_s10 = int_to_ptr.vmem [resolvable:$true] %s15_s10 }
   0x4   :  { %p170_p1 = scmp.lt.u32.totalorder %s166_s13, %s298_s0 }
   0x6   :  { %p172_p2 = pnand %p170_p1, %p167_p0 }
   0x8   :  { %175 = shalt.err (!%p172_p2)
}
   0x9   :  { %s176_s18 = scalar_lea.vmem %s16_s10, 512  ;;  %p181_p4 = scmp.lt.s32.totalorder %s16_s10, %s16_s10 }
   0xa   :  { %p177_p3 = scmp.ne.s32.totalorder %s16_s10, %s176_s18  ;;  %p182_p5 = scmp.lt.s32.totalorder %s176_s18, %s176_s18 }
   0xc   :  { %p183_p6 = por %p182_p5, %p181_p4 }
   0xe   :  { %p184_p7 = pnand %p183_p6, %p177_p3 }
  0x10   :  { %187 = shalt.err (!%p184_p7)
}
  0x11   :  { %s239_s19 = smov 128   ;;  %s240_s20 = smov 8  }
  0x12   :  { %21 = dma.hbm_to_vmem [thread:$0]  %s298_s0, 512, %s16_s10, [#allocation3], %s239_s19, %s239_s19, %s240_s20  }
  0x13   :  { %s241_s23 = smov [#allocation5]   ;;  %s188_s27 = scalar_lea.hbm %s299_s1, 512 }
  0x14   :  { %s27_s24 = sshll.u32 %s241_s23, 4  ;;  %p189_p8 = scmp.ne.s32.totalorder %s299_s1, %s188_s27  ;;  %s28_s24 = int_to_ptr.vmem [resolvable:$true] %s27_s24 }
  0x15   :  { %p192_p9 = scmp.lt.u32.totalorder %s188_s27, %s299_s1 }
  0x17   :  { %p194_p10 = pnand %p192_p9, %p189_p8 }
  0x19   :  { %197 = shalt.err (!%p194_p10)
}
  0x1a   :  { %s198_s4 = scalar_lea.vmem %s28_s24, 512  ;;  %p203_p12 = scmp.lt.s32.totalorder %s28_s24, %s28_s24 }
  0x1b   :  { %p199_p11 = scmp.ne.s32.totalorder %s28_s24, %s198_s4  ;;  %p204_p13 = scmp.lt.s32.totalorder %s198_s4, %s198_s4 }
  0x1d   :  { %p205_p0 = por %p204_p13, %p203_p12 }
  0x1f   :  { %p206_p1 = pnand %p205_p0, %p199_p11 }
  0x21   :  { %209 = shalt.err (!%p206_p1)
}
  0x22   :  { %33 = dma.hbm_to_vmem [thread:$0]  %s299_s1, 512, %s28_s24, [#allocation6], %s239_s19, %s239_s19, %s240_s20  }
  0x23   :  { %232 = dma.done.wait [#allocation3], 512  }
  0x24   :  { %233 = vsyncadd [#allocation3], 4294966784 }
  0x25   :  { %234 = dma.done.wait [#allocation6], 512  }
  0x26   :  { %235 = vsyncadd [#allocation6], 4294966784  ;;  %v42_v0 = vld [vmem:[#allocation2 + $0x10] sm:$0xff]  ;;  %v40_v2 = vld [vmem:[#allocation2] sm:$0xff]  ;;  %vm56_vm0 = vcmask 261120   ;;  %vm116_vm3 = vcmask 7168  }
  0x27   :  { %v46_v1 = vld [vmem:[#allocation5 + $0x10] sm:$0xff]  ;;  %v44_v4 = vld [vmem:[#allocation5] sm:$0xff]  ;;  %v43_v5 = vld [vmem:[#allocation2 + $0x18] sm:$0xff]  ;;  %s242_s1 = smov [#allocation7]  }
  0x28   :  { %v50_v3 = vsub.f32 %v42_v0, %v46_v1  ;;  %v47_v6 = vld [vmem:[#allocation5 + $0x18] sm:$0xff]  ;;  %v48_v7 = vsub.f32 %v40_v2, %v44_v4  ;;  %v41_v9 = vld [vmem:[#allocation2 + $0x8] sm:$0xff]  ;;  %s141_s6 = sshll.u32 %s242_s1, 4  ;;  %s142_s6 = int_to_ptr.vmem [resolvable:$true] %s141_s6 }
  0x29   :  { %v51_v8 = vsub.f32 %v43_v5, %v47_v6  ;;  %v45_v10 = vld [vmem:[#allocation5 + $0x8] sm:$0xff]  ;;  %s210_s8 = scalar_lea.vmem %s142_s6, 16  ;;  %s214_s9 = scalar_lea.vmem %s142_s6, 32 }
  0x2a   :  { %v54_v11 = vmul.f32 %v50_v3, %v50_v3  ;;  %v49_v12 = vsub.f32 %v41_v9, %v45_v10  ;;  %v52_v13 = vmul.f32 %v48_v7, %v48_v7  ;;  %p211_p2 = scmp.ne.s32.totalorder %s142_s6, %s210_s8  ;;  %p215_p3 = scmp.lt.s32.totalorder %s142_s6, %s142_s6 }
  0x2b   :  { %v55_v14 = vmul.f32 %v51_v8, %v51_v8  ;;  %p216_p4 = scmp.lt.s32.totalorder %s214_s9, %s210_s8 }
  0x2c   :  { %v63_v15 = vsel %vm56_vm0, %v54_v11, 0.0  ;;  %v53_v16 = vmul.f32 %v49_v12, %v49_v12  ;;  %v57_v17 = vsel %vm56_vm0, %v52_v13, 0.0 }
  0x2d   :  { %64 = vadd.xlane.f32.xlu1 %v63_v15  ;;  %58 = vadd.xlane.f32.xlu0 %v57_v17  ;;  %v66_v18 = vsel %vm56_vm0, %v55_v14, 0.0  ;;  %p217_p5 = por %p216_p4, %p215_p3 }
  0x2e   :  { %v60_v19 = vsel %vm56_vm0, %v53_v16, 0.0 }
  0x2f   :  { %p218_p6 = pnand %p217_p5, %p211_p2 }
  0x31   :  { %67 = vadd.xlane.f32.xlu1 %v66_v18  ;;  %61 = vadd.xlane.f32.xlu0 %v60_v19 }
  0xba   :  { %v65_v20 = vpop.xlane.xlu1 %64  ;;  %v59_v21 = vpop.xlane.xlu0 %58 }
  0xbb   :  { %158 = vrsqrt.f32 %v65_v20  ;;  %vm86_vm1 = vcmp.eq.f32.partialorder %v59_v21, inf  ;;  %v89_v31 = vand.u32 2147483648, %v59_v21  ;;  %vm100_vm2 = vcmp.eq.f32.partialorder %v65_v20, inf }
  0xbc   :  { %160 = vrsqrt.f32 %v59_v21  ;;  %vm88_vm4 = vcmp.eq.f32.partialorder %v59_v21, 0.0  ;;  %v103_v35 = vand.u32 2147483648, %v65_v20  ;;  %vm102_vm8 = vcmp.eq.f32.partialorder %v65_v20, 0.0 }
  0xbe   :  { %v68_v22 = vpop.xlane.xlu1 %67  ;;  %v62_v23 = vpop.xlane.xlu0 %61 }
  0xbf   :  { %162 = vrsqrt.f32 %v68_v22  ;;  %vm93_vm5 = vcmp.eq.f32.partialorder %v62_v23, inf  ;;  %v96_v36 = vand.u32 2147483648, %v62_v23  ;;  %vm107_vm6 = vcmp.eq.f32.partialorder %v68_v22, inf }
  0xc0   :  { %164 = vrsqrt.f32 %v62_v23  ;;  %vm95_vm7 = vcmp.eq.f32.partialorder %v62_v23, 0.0  ;;  %v110_v42 = vand.u32 2147483648, %v68_v22  ;;  %vm109_vm9 = vcmp.eq.f32.partialorder %v68_v22, 0.0 }
  0xc5   :  { %v159_v24 = vpop.eup %158 }
  0xc6   :  { %v161_v25 = vpop.eup %160  ;;  %v99_v26 = vmul.f32 %v159_v24, %v65_v20 }
  0xc7   :  { %v85_v27 = vmul.f32 %v161_v25, %v59_v21 }
  0xc8   :  { %v101_v34 = vsel %vm100_vm2, %v65_v20, %v99_v26 }
  0xc9   :  { %v163_v28 = vpop.eup %162  ;;  %v87_v29 = vsel %vm86_vm1, %v59_v21, %v85_v27  ;;  %v104_v41 = vsel %vm102_vm8, %v103_v35, %v101_v34 }
  0xca   :  { %v165_v30 = vpop.eup %164  ;;  %v106_v32 = vmul.f32 %v163_v28, %v68_v22  ;;  %v90_v37 = vsel %vm88_vm4, %v89_v31, %v87_v29  ;;  %v120_v47 = vsel %vm116_vm3, %v104_v41, 0.0 }
  0xcb   :  { %v92_v33 = vmul.f32 %v165_v30, %v62_v23  ;;  %v117_v43 = vsel %vm116_vm3, %v90_v37, 0.0 }
  0xcc   :  { %v108_v39 = vsel %vm107_vm6, %v68_v22, %v106_v32 }
  0xcd   :  { %v94_v38 = vsel %vm93_vm5, %v62_v23, %v92_v33  ;;  %v111_v45 = vsel %vm109_vm9, %v110_v42, %v108_v39 }
  0xce   :  { %v97_v40 = vsel %vm95_vm7, %v96_v36, %v94_v38  ;;  %v122_v49 = vsel %vm116_vm3, %v111_v45, 0.0 }
  0xcf   :  { %v118_v44 = vsel %vm116_vm3, %v97_v40, 0.0 }
  0xd0   :  { %v119_v46 = vadd.f32 %v118_v44, %v117_v43 }
  0xd2   :  { %v121_v48 = vadd.f32 %v120_v47, %v119_v46 }
  0xd4   :  { %v123_v50 = vadd.f32 %v122_v49, %v121_v48 }
  0xd6   :  { %124 = vadd.xlane.f32.xlu0 %v123_v50 }
 0x163   :  { %v125_v51 = vpop.xlane.xlu0 %124 }
 0x164   :  { %v126_v52 = vrot.slane %v125_v51, 4 }
 0x166   :  { %v127_v53 = vadd.f32 %v126_v52, %v125_v51 }
 0x168   :  { %v128_v54 = vrot.slane %v127_v53, 2 }
 0x16a   :  { %v129_v55 = vadd.f32 %v128_v54, %v127_v53 }
 0x16c   :  { %v130_v56 = vrot.slane %v129_v55, 1 }
 0x16e   :  { %v131_v57 = vadd.f32 %v130_v56, %v129_v55 }
 0x170   :  { %151 = vpush %v131_v57 }
 0x1a1   :  { %s152_s7 = spop %151 }
 0x1a2   :  { %v133_v58 = vstv %s152_s7 }
 0x1a3   :  { %134 = vst [vmem:[#allocation7] sm:$0x1] %v133_v58 }
 0x1a4   :  { %221 = shalt.err (!%p218_p6)
}
 0x1a5   :  { %s222_s12 = scalar_lea.hbm %s300_s2, 16 }
 0x1a6   :  { %p223_p7 = scmp.ne.s32.totalorder %s300_s2, %s222_s12  ;;  %p226_p8 = scmp.lt.u32.totalorder %s222_s12, %s300_s2 }
 0x1a8   :  { %p228_p9 = pnand %p226_p8, %p223_p7 }
 0x1aa   :  { %231 = shalt.err (!%p228_p9)
}
 0x1ab   :  { %144 = dma.vmem_to_hbm [thread:$0]  %s142_s6, 16, %s300_s2, [#allocation4]  }
 0x1ac   :  { %236 = dma.done.wait [#allocation4], 16  }
 0x1ad   :  { %237 = vsyncadd [#allocation4], 4294967280 }
 0x1ae   :  { %148 = vsyncpa [#allocation3], 1 }
 0x1af   :  { %149 = vsyncpa [#allocation6], 1 }
 0x1b0   :  { %150 = vsyncpa [#allocation4], 1 }

</bundles_post_ra>
